<compile_context>
chip_gen: v5e
topology: v5e:2x2
jax: 0.10.0
libtpu: 0.0.40
codegen_flags: <defaults>
</compile_context>

<pallas_src>
import functools

import jax
import jax.numpy as jnp
from jax import lax
from jax.experimental import pallas as pl
from jax.experimental.pallas import tpu as pltpu


def _ln_kernel_with_bias(x_ref, w_ref, b_ref, o_ref, *, eps: float):
    # x_ref / o_ref: (C, THW) -- C on sublanes, HW on lanes (lane-dense).
    # w_ref / b_ref: (C, 1)
    x = x_ref[...].astype(jnp.float32)
    inv_c = 1.0 / x.shape[0]
    mu = jnp.sum(x, axis=0, keepdims=True) * inv_c           # (1, THW)
    xc = x - mu
    var = jnp.sum(xc * xc, axis=0, keepdims=True) * inv_c    # unbiased=False
    inv = lax.rsqrt(var + eps)
    w = w_ref[...].astype(jnp.float32)                        # (C, 1)
    b = b_ref[...].astype(jnp.float32)                        # (C, 1)
    o_ref[...] = (xc * inv * w + b).astype(o_ref.dtype)


def _ln_kernel_bias_free(x_ref, w_ref, o_ref, *, eps: float):
    # BiasFree: variance is about the mean, but the output uses un-centered x.
    x = x_ref[...].astype(jnp.float32)
    inv_c = 1.0 / x.shape[0]
    mu = jnp.sum(x, axis=0, keepdims=True) * inv_c
    xc = x - mu
    var = jnp.sum(xc * xc, axis=0, keepdims=True) * inv_c
    inv = lax.rsqrt(var + eps)
    w = w_ref[...].astype(jnp.float32)
    o_ref[...] = (x * inv * w).astype(o_ref.dtype)


def _vmem_capacity_bytes() -> int:
    """Best-effort query of per-core VMEM; conservative (v7x-sized) fallback."""
    try:
        info = pltpu.get_tpu_info()
        cap = getattr(info, "vmem_capacity_bytes", None)
        if cap:
            return int(cap)
    except Exception:
        pass
    return 64 << 20


def _pick_tile_hw(c: int, hw: int, batch: int, dtype_bytes: int,
                  target_tile_bytes: int, min_grid_steps: int = 8) -> int:
    """Largest lane-dense HW tile (multiple of 128, <= hw) within a byte budget."""
    if hw <= 128:
        return hw  # single block equal to the full (last) array dim -> always legal
    # Honest VMEM accounting: channels are padded to a full sublane group.
    sublane = 8 * max(1, 4 // dtype_bytes)        # 8 (f32), 16 (bf16), 32 (int8)
    c_pad = pl.cdiv(c, sublane) * sublane
    row_bytes = max(1, c_pad * dtype_bytes)
    max_thw = max(128, (target_tile_bytes // row_bytes) // 128 * 128)
    thw = min((hw // 128) * 128, max_thw)         # never exceed the array extent
    # v7x megacore: keep enough grid steps so both TensorCores have work.
    while thw > 128 and batch * pl.cdiv(hw, thw) < min_grid_steps:
        thw = max(128, ((thw // 2) // 128) * 128)
    return thw


def layernorm_nchw(x, weight, bias=None, *, layernorm_type: str = "WithBias",
                   eps: float = 1e-5):
    """Equivalent of the PyTorch LayerNorm module forward (NCHW in/out)."""
    b, c, h, w = x.shape
    hw = h * w
    x3 = x.reshape(b, c, hw)  # free metadata reshape, no transpose, no pad

    vmem_cap = _vmem_capacity_bytes()
    if vmem_cap >= (96 << 20):        # v5e / v6e: 128 MiB VMEM -> bigger tiles
        target_tile_bytes = 6 << 20
        vmem_limit = 64 << 20
    else:                             # v7x: 64 MiB per TC -> cap tiles & limit
        target_tile_bytes = 3 << 20
        vmem_limit = 48 << 20

    dtype_bytes = jnp.dtype(x.dtype).itemsize
    thw = _pick_tile_hw(c, hw, b, dtype_bytes, target_tile_bytes)

    w2 = weight.reshape(c, 1)
    bias_free = (layernorm_type == "BiasFree")

    x_spec = pl.BlockSpec((None, c, thw), lambda bi, ti: (bi, 0, ti))
    p_spec = pl.BlockSpec((c, 1), lambda bi, ti: (0, 0))
    out_spec = pl.BlockSpec((None, c, thw), lambda bi, ti: (bi, 0, ti))

    if bias_free:
        kernel = functools.partial(_ln_kernel_bias_free, eps=eps)
        in_specs = [x_spec, p_spec]
        args = (x3, w2)
    else:
        assert bias is not None, "WithBias LayerNorm requires a bias parameter"
        kernel = functools.partial(_ln_kernel_with_bias, eps=eps)
        in_specs = [x_spec, p_spec, p_spec]
        args = (x3, w2, bias.reshape(c, 1))

    y3 = pl.pallas_call(
        kernel,
        out_shape=jax.ShapeDtypeStruct((b, c, hw), x.dtype),
        grid_spec=pltpu.PrefetchScalarGridSpec(
            num_scalar_prefetch=0,
            grid=(b, pl.cdiv(hw, thw)),   # ragged edge block handled by masking
            in_specs=in_specs,
            out_specs=out_spec,
        ),
        compiler_params=pltpu.CompilerParams(
            dimension_semantics=("parallel", "parallel"),
            vmem_limit_bytes=vmem_limit,
        ),
    )(*args)

    return y3.reshape(b, c, h, w)


def _reference_nchw(x, weight, bias, layernorm_type, eps=1e-5):
    xf = x.astype(jnp.float32)
    mu = jnp.mean(xf, axis=1, keepdims=True)
    var = jnp.mean((xf - mu) ** 2, axis=1, keepdims=True)
    wb = weight.reshape(1, -1, 1, 1).astype(jnp.float32)
    if layernorm_type == "BiasFree":
        y = xf / jnp.sqrt(var + eps) * wb
    else:
        bb = bias.reshape(1, -1, 1, 1).astype(jnp.float32)
        y = (xf - mu) / jnp.sqrt(var + eps) * wb + bb
    return y.astype(x.dtype)


if __name__ == "__main__":
    key = jax.random.PRNGKey(0)
    kx, kw, kb = jax.random.split(key, 3)

    B, C = 2, 4
    # Non-trivial (but deterministic) params to exercise scale/shift paths.
    weight = 1.0 + 0.1 * jax.random.normal(kw, (C,), dtype=jnp.float32)
    bias = 0.1 * jax.random.normal(kb, (C,), dtype=jnp.float32)

    ok = True
    # (16,16): HW multiple of 128; (15,15): ragged edge block (masked stores).
    for (H, W) in ((16, 16), (15, 15)):
        x = jax.random.normal(kx, (B, C, H, W), dtype=jnp.float32)
        for ln_type in ("WithBias", "BiasFree"):
            out = layernorm_nchw(x, weight, bias, layernorm_type=ln_type)
            out = jax.block_until_ready(out)
            ref = _reference_nchw(x, weight, bias, ln_type)
            if not jnp.allclose(out, ref, atol=1e-4, rtol=1e-4):
                ok = False

    if ok:
        print("KERNEL_OK")
</pallas_src>

<mosaic_0001>
module attributes {stable_mosaic.version = 11 : i64} {
  func.func @_ln_kernel_with_bias(%arg0: i32, %arg1: i32, %arg2: memref<1x4x128xf32, #tpu.memory_space<vmem>>, %arg3: memref<4x1xf32, #tpu.memory_space<vmem>>, %arg4: memref<4x1xf32, #tpu.memory_space<vmem>>, %arg5: memref<1x4x128xf32, #tpu.memory_space<vmem>>) attributes {dimension_semantics = [#tpu.dimension_semantics<parallel>, #tpu.dimension_semantics<parallel>], iteration_bounds = array<i64: 2, 2>, scalar_prefetch = 0 : i64, scratch_operands = 0 : i64, tpu.core_type = #tpu.core_type<tc>, window_params = [{transform_indices = @transform_0, window_bounds = array<i64: 1, 4, 128>}, {pipeline_mode = #tpu.pipeline_mode<synchronous>, transform_indices = @transform_1, window_bounds = array<i64: 4, 1>}, {pipeline_mode = #tpu.pipeline_mode<synchronous>, transform_indices = @transform_2, window_bounds = array<i64: 4, 1>}, {transform_indices = @transform_3, window_bounds = array<i64: 1, 4, 128>}]} {
    %c0 = arith.constant 0 : index
    %c0_0 = arith.constant 0 : index
    %c0_1 = arith.constant 0 : index
    %0 = vector.load %arg2[%c0, %c0_0, %c0_1] : memref<1x4x128xf32, #tpu.memory_space<vmem>>, vector<1x4x128xf32>
    %1 = vector.shape_cast %0 : vector<1x4x128xf32> to vector<4x128xf32>
    %cst = arith.constant dense<0.000000e+00> : vector<128xf32>
    %2 = vector.multi_reduction <add>, %1, %cst [0] : vector<4x128xf32> to vector<128xf32>
    %3 = vector.shape_cast %2 : vector<128xf32> to vector<1x128xf32>
    %cst_2 = arith.constant 2.500000e-01 : f32
    %4 = vector.broadcast %cst_2 : f32 to vector<1x128xf32>
    %5 = arith.mulf %3, %4 : vector<1x128xf32>
    %6 = vector.broadcast %5 : vector<1x128xf32> to vector<4x128xf32>
    %7 = arith.subf %1, %6 : vector<4x128xf32>
    %8 = arith.mulf %7, %7 : vector<4x128xf32>
    %cst_3 = arith.constant dense<0.000000e+00> : vector<128xf32>
    %9 = vector.multi_reduction <add>, %8, %cst_3 [0] : vector<4x128xf32> to vector<128xf32>
    %10 = vector.shape_cast %9 : vector<128xf32> to vector<1x128xf32>
    %cst_4 = arith.constant 2.500000e-01 : f32
    %11 = vector.broadcast %cst_4 : f32 to vector<1x128xf32>
    %12 = arith.mulf %10, %11 : vector<1x128xf32>
    %cst_5 = arith.constant 9.99999974E-6 : f32
    %13 = vector.broadcast %cst_5 : f32 to vector<1x128xf32>
    %14 = arith.addf %12, %13 : vector<1x128xf32>
    %15 = math.rsqrt %14 : vector<1x128xf32>
    %c0_6 = arith.constant 0 : index
    %c0_7 = arith.constant 0 : index
    %16 = vector.load %arg3[%c0_6, %c0_7] : memref<4x1xf32, #tpu.memory_space<vmem>>, vector<4x1xf32>
    %c0_8 = arith.constant 0 : index
    %c0_9 = arith.constant 0 : index
    %17 = vector.load %arg4[%c0_8, %c0_9] : memref<4x1xf32, #tpu.memory_space<vmem>>, vector<4x1xf32>
    %18 = vector.broadcast %15 : vector<1x128xf32> to vector<4x128xf32>
    %19 = arith.mulf %7, %18 : vector<4x128xf32>
    %20 = vector.broadcast %16 : vector<4x1xf32> to vector<4x128xf32>
    %21 = arith.mulf %19, %20 : vector<4x128xf32>
    %22 = vector.broadcast %17 : vector<4x1xf32> to vector<4x128xf32>
    %23 = arith.addf %21, %22 : vector<4x128xf32>
    %c0_10 = arith.constant 0 : index
    %c0_11 = arith.constant 0 : index
    %c0_12 = arith.constant 0 : index
    %24 = vector.load %arg5[%c0_10, %c0_11, %c0_12] : memref<1x4x128xf32, #tpu.memory_space<vmem>>, vector<1x4x128xf32>
    %25 = vector.shape_cast %24 : vector<1x4x128xf32> to vector<4x128xf32>
    %26 = vector.shape_cast %23 : vector<4x128xf32> to vector<1x4x128xf32>
    tpu.vector_store %arg5[%c0_10, %c0_11, %c0_12], %26 {strides = array<i32>} : memref<1x4x128xf32, #tpu.memory_space<vmem>>, vector<1x4x128xf32>,
    return
  }
  func.func @transform_0(%arg0: i32, %arg1: i32) -> (i32, i32, i32) {
    %c0_i32 = arith.constant 0 : i32
    %c0_i32_0 = arith.constant 0 : i32
    return %arg0, %c0_i32, %arg1 : i32, i32, i32
  }
  func.func @transform_1(%arg0: i32, %arg1: i32) -> (i32, i32) {
    %c0_i32 = arith.constant 0 : i32
    %c0_i32_0 = arith.constant 0 : i32
    %c0_i32_1 = arith.constant 0 : i32
    return %c0_i32, %c0_i32_0 : i32, i32
  }
  func.func @transform_2(%arg0: i32, %arg1: i32) -> (i32, i32) {
    %c0_i32 = arith.constant 0 : i32
    %c0_i32_0 = arith.constant 0 : i32
    %c0_i32_1 = arith.constant 0 : i32
    return %c0_i32, %c0_i32_0 : i32, i32
  }
  func.func @transform_3(%arg0: i32, %arg1: i32) -> (i32, i32, i32) {
    %c0_i32 = arith.constant 0 : i32
    %c0_i32_0 = arith.constant 0 : i32
    return %arg0, %c0_i32, %arg1 : i32, i32, i32
  }
}

</mosaic_0001>

<bundles_post_ra>
// kernel: tpu_custom_call.1
= control target key start
LH: loop header
LB: loop body
LE: loop exit
PB: predicated region body
PF: predicated region fallthrough
CT: control target
= control target key end

     0   :  { %8 = vsyncpa [#allocation3], 0  ;;  %s756_s0 = inlined_call_operand.hbm [shape: f32[2,4,256], index: 0, kind: input, shape index: {}]   ;;  %s757_s1 = inlined_call_operand.vmem [shape: f32[4,1], index: 1, kind: input, shape index: {}]   ;;  %s758_s2 = inlined_call_operand.vmem [shape: f32[4,1], index: 2, kind: input, shape index: {}]   ;;  %s759_s3 = inlined_call_operand.hbm [shape: f32[2,4,256], index: 3, kind: output, shape index: {}]  }
   0x1   :  { %10 = vsyncpa [#allocation3 + $0x1], 0 }
   0x2   :  { %11 = vsyncpa [#allocation4], 0 }
   0x3   :  { %13 = vsyncpa [#allocation4 + $0x1], 0  ;;  %s604_s12 = smov 0   ;;  %s606_s13 = smov 0  }
   0x4   :  { %s608_s14 = smov 0   ;;  %s610_s15 = smov 0  }
   0x5   :  { %s612_s16 = smov 0   ;;  %s614_s17 = smov 0  }
   0x6   :  { %s616_s18 = smov 0   ;;  %s618_s19 = smov 0  }
   0x7 LB: > { %s356_s20 = sadd.s32 4294967295, %s581_s19   ;;  %s357_s21 = sadd.s32 4294967294, %s581_s19   ;;  %s581_s19 = sphi %s618_s19, %s19_s19   ;;  %s577_s18 = sphi %s616_s18, %s773_s18   ;;  %s573_s17 = sphi %s614_s17, %s772_s17   ;;  %s569_s16 = sphi %s612_s16, %s771_s16   ;;  %s565_s15 = sphi %s610_s15, %s770_s15   ;;  %s561_s14 = sphi %s608_s14, %s769_s14   ;;  %s557_s13 = sphi %s606_s13, %s768_s13   ;;  %s553_s12 = sphi %s604_s12, %s767_s12  }
   0x8   : > { %s28_s22 = sadd.s32 1, %s573_s17  ;;  %s31_s23 = sadd.s32 1, %s577_s18 }
   0x9   : > { %p29_p0 = scmp.ge.s32.totalorder %s28_s22, 2  ;;  %s40_s24 = sadd.s32 1, %s561_s14 }
   0xa   : > { %p47_p1 = scmp.ne.s32.totalorder %s561_s14, %s557_s13  ;;  %p48_p2 = scmp.eq.s32.totalorder %s581_s19, 0 }
   0xb   : > { %s775_s22 = smov (%p29_p0, %s28_s22), 0  ;;  %s777_s23 = smov (!%p29_p0, %s31_s23), %s577_s18 }
   0xc   : > { %s36_s25 = ssub.s32 %s573_s17, %s775_s22  ;;  %p657_p3 = por %p48_p2, %p47_p1 }
   0xd   : > { %p33_p4 = scmp.ge.s32.totalorder %s777_s23, 2  ;;  %p53_p5 = scmp.ne.s32.totalorder %s557_s13, %s553_s12 }
   0xe   : > { %p54_p6 = scmp.eq.s32.totalorder %s356_s20, 0  ;;  %p121_p7 = scmp.eq.s32.totalorder %s356_s20, 3 }
   0xf   : > { %s779_s23 = smov (%p33_p4, %s777_s23), 0  ;;  %p127_p10 = scmp.eq.s32.totalorder %s357_s21, 3 }
  0x10   : > { %762 = sst [smem:[#allocation8_spill]] %s779_s23  ;;  %p665_p8 = por %p54_p6, %p53_p5 }
  0x11   : > { %p669_p9 = por %p121_p7, %p47_p1  ;;  %s35_s29 = ssub.s32 %s577_s18, %s779_s23 }
  0x12   : > { %s37_s30 = sor.u32 %s36_s25, %s35_s29  ;;  %p675_p12 = por %p127_p10, %p53_p5 }
  0x13   : > { %p38_p11 = scmp.eq.s32.totalorder %s37_s30, 0  ;;  %p383_p13 = scmp.lt.s32.totalorder %s581_s19, 4 }
  0x14   : > { %s153_s5 = sand.u32 1, %s561_s14   ;;  %s361_s8 = sshll.u32 %s577_s18, 1 }
  0x15   : > { %s682_s6 = scalar_select %p38_p11, %s561_s14, %s40_s24  }
  0x16   : > { %s360_s7 = sshll.u32 %s153_s5, 2  ;;  %s161_s9 = sadd.s32 %s573_s17, %s361_s8 }
  0x17   : > { %s157_s10 = scalar_lea.vmem [#allocation2], %s360_s7  ;;  %s362_s20 = sshll.u32 %s161_s9, 2 }
  0x18   : > { %s167_s11 = sshll.u32 %s157_s10, 4  ;;  %s163_s29 = scalar_lea.hbm %s756_s0, %s362_s20  ;;  %s168_s11 = int_to_ptr.vmem [resolvable:$true] %s167_s11 }
  0x19   : > { %p376_p0 = pnand %p383_p13, %p657_p3  ;;  %s165_s30 = sshll.u32 %s163_s29, 4  ;;  %s166_s30 = int_to_ptr.hbm [resolvable:$true] %s165_s30 }
  0x1a   : > { %p363_p1 = scmp.ge.s32.totalorder %s581_s19, 1  ;;  %s154_s23 = scalar_lea.sflag [#allocation3], %s153_s5 }
  0x1b   : > { %378 = dma.hbm_to_vmem [thread:$0]  (!%p376_p0), %s166_s30, 64, %s168_s11, %s154_s23  }
  0x1c   : > { %p172_p2 = scmp.lt.s32.totalorder %s581_s19, 5 }
  0x1e   : > { %p173_p4 = pnand %p363_p1, %p172_p2 }
  0x1f   : > { %s694_s24 = sand.u32 (!%p173_p4), 1, %s557_s13  }
  0x20   : > { %176 = sbr.rel (%p173_p4) target bundleno = 168 (0xa8), region = 32  ;;  %s364_s7 = sshll.u32 (!%p173_p4), %s694_s24, 2 }
  0x21   : > { %s179_s8 = scalar_lea.sflag (!%p173_p4), [#allocation3], %s694_s24  ;;  %s182_s26 = scalar_lea.vmem (!%p173_p4), [#allocation2], %s364_s7 }
  0x25   : > { %544 = dma.done.wait (%p665_p8), %s179_s8, 64  }
  0x26   : > { %546 = vsyncadd (%p665_p8), %s179_s8, 4294967232  ;;  %v583_v0 = vmov 0   ;;  %v237_v1 = vld [vmem:[%s757_s1] sm:$0xf]  ;;  %vm207_vm0 = vcmask 1043456   ;;  %s367_s27 = sshll.u32 %s569_s16, 1 }
  0x27   : > { %450 = vset.pattern.permute.xlu0 %v583_v0  ;;  %v238_v2 = vld [vmem:[%s758_s2] sm:$0xf]  ;;  %s264_s11 = sadd.s32 %s565_s15, %s367_s27  ;;  %s205_s30 = scalar_lea.vmem [#allocation5], %s364_s7 }
  0x28   : > { %242 = vperm.xlu0 %450, %v237_v1   ;;  %v206_v3 = vld [vmem:[%s182_s26] sm:$0xf]  ;;  %s368_s20 = sshll.u32 %s264_s11, 2  ;;  %s268_s8 = sshll.u32 %s205_s30, 4  ;;  %s269_s8 = int_to_ptr.vmem [resolvable:$true] %s268_s8 }
  0x29   : > { %v208_v4 = vsel %vm207_vm0, %v206_v3, 0.0  ;;  %s266_s29 = scalar_lea.hbm %s759_s3, %s368_s20  ;;  %s254_s15 = scalar_lea.sflag [#allocation4], %s694_s24 }
  0x2a   : > { %v209_v5 = vrot.slane %v208_v4, 4  ;;  %s270_s26 = sshll.u32 %s266_s29, 4  ;;  %s503_s7 = scalar_lea.hbm %s759_s3, 16  ;;  %s271_s26 = int_to_ptr.hbm [resolvable:$true] %s270_s26 }
  0x2b   : > { %s497_s16 = sshra.s32 %s271_s26, 4  ;;  %s498_s16 = int_to_ptr.hbm [resolvable:$true] %s497_s16 }
  0x2c   : > { %v210_v6 = vadd.f32 %v209_v5, %v208_v4  ;;  %s499_s23 = scalar_lea.hbm %s498_s16, 4  ;;  %p504_p7 = scmp.lt.s32.totalorder %s498_s16, %s759_s3 }
  0x2d   : > { %p500_p3 = scmp.ne.s32.totalorder %s498_s16, %s499_s23  ;;  %p505_p8 = scmp.lt.s32.totalorder %s503_s7, %s499_s23 }
  0x2e   : > { %v211_v7 = vrot.slane %v210_v6, 2 }
  0x2f   : > { %p501_p5 = pnand %p500_p3, %p669_p9  ;;  %p506_p10 = por %p505_p8, %p504_p7 }
  0x30   : > { %248 = vperm.xlu0 %450, %v238_v2   ;;  %v212_v8 = vadd.f32 %v211_v7, %v210_v6 }
  0x31   : > { %p502_p6 = pneg %p501_p5 }
  0x32   : > { %v213_v9 = vrot.slane %v212_v8, 1 }
  0x33   : > { %p507_p11 = pnand %p506_p10, %p502_p6 }
  0x34   : > { %v214_v10 = vadd.f32 %v213_v9, %v212_v8 }
  0x36   : > { %v215_v11 = vmul.f32 0.25, %v214_v10 }
  0x38   : > { %v216_v12 = vsub.f32 %v206_v3, %v215_v11 }
  0x3a   : > { %v217_v13 = vmul.f32 %v216_v12, %v216_v12 }
  0x3c   : > { %v218_v14 = vsel %vm207_vm0, %v217_v13, 0.0 }
  0x3d   : > { %v219_v15 = vrot.slane %v218_v14, 4 }
  0x3f   : > { %v220_v16 = vadd.f32 %v219_v15, %v218_v14 }
  0x41   : > { %v221_v17 = vrot.slane %v220_v16, 2 }
  0x43   : > { %v222_v18 = vadd.f32 %v221_v17, %v220_v16 }
  0x45   : > { %v223_v19 = vrot.slane %v222_v18, 1 }
  0x47   : > { %v224_v20 = vadd.f32 %v223_v19, %v222_v18 }
  0x49   : > { %v225_v21 = vmul.f32 0.25, %v224_v20 }
  0x4b   : > { %v226_v22 = vadd.f32 1e-05, %v225_v21 }
  0x4d   : > { %451 = vrsqrt.f32 %v226_v22  ;;  %vm233_vm1 = vweird.f32 %v226_v22 }
  0x53   : > { %v452_v23 = vpop.eup %451 }
  0x54   : > { %v228_v24 = vmul.f32 %v452_v23, %v226_v22  ;;  %vm234_vm2 = vweird.f32 %v452_v23 }
  0x55   : > { %vm235_vm3 = vmor %vm233_vm1, %vm234_vm2 }
  0x56   : > { %v229_v25 = vmul.f32 %v452_v23, %v228_v24 }
  0x58   : > { %v230_v26 = vmul.f32 0.5, %v229_v25 }
  0x5a   : > { %v231_v27 = vsub.f32 1.5, %v230_v26 }
  0x5c   : > { %v232_v28 = vmul.f32 %v452_v23, %v231_v27 }
  0x5e   : > { %v236_v30 = vsel %vm235_vm3, %v452_v23, %v232_v28 }
  0x5f   : > { %v239_v31 = vmul.f32 %v236_v30, %v216_v12 }
  0x9a   : > { %v243_v29 = vpop.permute.xlu0 %242 }
  0x9b   : > { %v245_v32 = vmul.f32 %v243_v29, %v239_v31 }
  0xa2   : > { %v249_v33 = vpop.permute.xlu0 %248 }
  0xa3   : > { %v251_v34 = vadd.f32 %v249_v33, %v245_v32 }
  0xa5   : > { %252 = vst [vmem:[%s205_s30] sm:$0xf] %v251_v34 }
  0xa6   : > { %510 = shalt.err (!%p507_p11)
}
  0xa7   : > { %373 = dma.vmem_to_hbm [thread:$0]  (%p669_p9), %s269_s8, 64, %s271_s26, %s254_s15  }
  0xa8 PF: > { %p384_p13 = scmp.ge.s32.totalorder %s581_s19, 2  ;;  %s282_s24 = sand.u32 1, %s553_s12  }
  0xa9   : > { %s283_s11 = scalar_lea.sflag [#allocation4], %s282_s24 }
  0xaa   : > { %p380_p0 = pnand %p384_p13, %p675_p12 }
  0xac   : > { %p381_p1 = pneg %p380_p0 }
  0xae   : > { %548 = dma.done.wait (%p381_p1), %s283_s11, 64  }
  0xaf   : > { %550 = vsyncadd (%p381_p1), %s283_s11, 4294967232  ;;  %s19_s19 = sadd.s32 1, %s581_s19   ;;  %s766_s28 = sld [smem:[#allocation8_spill]] }
  0xb0   : > { %p16_p2 = scmp.ge.s32.totalorder %s19_s19, 6   ;;  %s767_s12 = smov %s557_s13 }
  0xb1   : > { %s768_s13 = smov %s561_s14  ;;  %s769_s14 = smov %s682_s6 }
  0xb2   : > { %s770_s15 = smov %s573_s17  ;;  %s771_s16 = smov %s577_s18 }
  0xb3   : > { %s772_s17 = smov %s775_s22  ;;  %18 = sbr.rel (!%p16_p2) target bundleno = 7 (0x7), region = 77 }
  0xb5   : > { %s773_s18 = smov %s766_s28 }
  0xb8   :  { %289 = vsyncpa [#allocation3], 1 }
  0xb9   :  { %291 = vsyncpa [#allocation3 + $0x1], 1 }
  0xba   :  { %292 = vsyncpa [#allocation4], 1 }
  0xbb   :  { %294 = vsyncpa [#allocation4 + $0x1], 1 }

</bundles_post_ra>
